<compile_context>
chip_gen: v6e
topology: v6e:2x2x1
jax: 0.10.0
libtpu: 0.0.40
codegen_flags: <defaults>
</compile_context>

<pallas_src>
import functools
import math

import jax
import jax.numpy as jnp
from jax.experimental import pallas as pl
from jax.experimental.pallas import tpu as pltpu


def att_block_kernel(x_ref, w_ref, b_ref, out_ref, norm_att_ref, cla_ref,
                     *, activation, c_out, b_t):
    # x_ref:        (B_t, C_in, T)
    # w_ref:        (2*C_out, C_in)   fused [W_att; W_cla]
    # b_ref:        (2*C_out, 1)      fused [b_att; b_cla]
    # out_ref:      (B_t, C_out)
    # norm_att_ref: (B_t, C_out, T)
    # cla_ref:      (B_t, C_out, T)
    w = w_ref[...]
    bias = b_ref[...].astype(jnp.float32)                 # (2*C_out, 1)

    for bi in range(b_t):                                  # static unrolled loop
        x = x_ref[bi]                                      # (C_in, T)

        # --- single fused 1x1 conv (both att and cla heads) ---
        y = jnp.dot(w, x, preferred_element_type=jnp.float32) + bias  # (2*C_out, T)

        att = y[:c_out, :]                                 # (C_out, T)
        cla = y[c_out:, :]                                 # (C_out, T)

        # --- tanh + softmax over time; tanh is bounded so no max-subtract ---
        e = jnp.exp(jnp.tanh(att))
        denom = jnp.sum(e, axis=-1, keepdims=True)
        norm_att = e * pl.reciprocal(denom, approx=True)   # (C_out, T)

        if activation == "sigmoid":
            cla = jax.nn.sigmoid(cla)
        # activation == "linear": identity

        pooled = jnp.sum(norm_att * cla, axis=-1)          # (C_out,)

        out_ref[bi, :] = pooled.astype(out_ref.dtype)
        norm_att_ref[bi] = norm_att.astype(norm_att_ref.dtype)
        cla_ref[bi] = cla.astype(cla_ref.dtype)


def _pick_batch_tile(B, C_in, C_out, T, bytes_per_elem, budget_bytes):
    """Largest divisor of B whose double-buffered block set fits the budget."""
    per_batch = (C_in * T                      # x block
                 + 2 * (2 * C_out) * T         # norm_att + cla blocks (f32-ish)
                 + C_out) * bytes_per_elem * 2  # double-buffered
    bt = max(1, min(B, 8, budget_bytes // max(per_batch, 1)))
    while B % bt:
        bt -= 1
    return bt


def att_block_v2(x, w_att, b_att, w_cla, b_cla, activation="linear"):
    """x: (B, C_in, T); weights (C_out, C_in); biases (C_out,)."""
    B, C_in, T = x.shape
    C_out = w_att.shape[0]
    out_dtype = x.dtype

    # Fuse the two heads: one weight operand, one bias operand.
    w_fused = jnp.concatenate([w_att, w_cla], axis=0)              # (2*C_out, C_in)
    b_fused = jnp.concatenate([b_att, b_cla], axis=0).reshape(2 * C_out, 1)

    bytes_per_elem = jnp.dtype(out_dtype).itemsize
    B_t = _pick_batch_tile(B, C_in, C_out, T, max(bytes_per_elem, 4),
                           budget_bytes=8 * 1024 * 1024)

    kernel = functools.partial(att_block_kernel, activation=activation,
                               c_out=C_out, b_t=B_t)

    out_shapes = (
        jax.ShapeDtypeStruct((B, C_out), out_dtype),        # pooled
        jax.ShapeDtypeStruct((B, C_out, T), out_dtype),     # norm_att
        jax.ShapeDtypeStruct((B, C_out, T), out_dtype),     # cla
    )

    grid_spec = pltpu.PrefetchScalarGridSpec(
        num_scalar_prefetch=0,
        grid=(B // B_t,),
        in_specs=[
            pl.BlockSpec((B_t, C_in, T), lambda i: (i, 0, 0)),      # x
            pl.BlockSpec((2 * C_out, C_in), lambda i: (0, 0)),      # fused weights
            pl.BlockSpec((2 * C_out, 1), lambda i: (0, 0)),         # fused biases
        ],
        out_specs=[
            pl.BlockSpec((B_t, C_out), lambda i: (i, 0)),
            pl.BlockSpec((B_t, C_out, T), lambda i: (i, 0, 0)),
            pl.BlockSpec((B_t, C_out, T), lambda i: (i, 0, 0)),
        ],
    )

    return pl.pallas_call(
        kernel,
        out_shape=out_shapes,
        grid_spec=grid_spec,
        compiler_params=pltpu.CompilerParams(
            dimension_semantics=("parallel",),
            vmem_limit_bytes=32 * 1024 * 1024,
        ),
    )(x, w_fused, b_fused)


def xavier_uniform_conv1d(key, out_features, in_features):
    # PyTorch xavier_uniform_ on Conv1d weight (out, in, k=1):
    # fan_in = in * k, fan_out = out * k, bound = sqrt(6 / (fan_in + fan_out))
    bound = math.sqrt(6.0 / (in_features + out_features))
    return jax.random.uniform(key, (out_features, in_features),
                              minval=-bound, maxval=bound, dtype=jnp.float32)


def reference_att_block(x, w_att, b_att, w_cla, b_cla, activation="linear"):
    # Pure-JAX reference for a sanity check.
    att = jnp.einsum("oc,bct->bot", w_att, x) + b_att[None, :, None]
    norm_att = jax.nn.softmax(jnp.tanh(att), axis=-1)
    cla = jnp.einsum("oc,bct->bot", w_cla, x) + b_cla[None, :, None]
    if activation == "sigmoid":
        cla = jax.nn.sigmoid(cla)
    pooled = jnp.sum(norm_att * cla, axis=2)
    return pooled, norm_att, cla


if __name__ == "__main__":
    B, C_IN, C_OUT, T = 2, 32, 8, 16
    key = jax.random.PRNGKey(0)
    k_x, k_watt, k_wcla = jax.random.split(key, 3)

    x = jax.random.normal(k_x, (B, C_IN, T), dtype=jnp.float32)
    w_att = xavier_uniform_conv1d(k_watt, C_OUT, C_IN)
    w_cla = xavier_uniform_conv1d(k_wcla, C_OUT, C_IN)
    b_att = jnp.zeros((C_OUT,), jnp.float32)   # init_layer fills bias with 0
    b_cla = jnp.zeros((C_OUT,), jnp.float32)

    pooled, norm_att, cla = att_block_v2(x, w_att, b_att, w_cla, b_cla,
                                         activation="linear")
    jax.block_until_ready((pooled, norm_att, cla))

    # Correctness check vs pure-JAX reference (tolerances loosened slightly for
    # the approximate EUP reciprocal used in the softmax normalization).
    r_pooled, r_norm, r_cla = reference_att_block(x, w_att, b_att, w_cla, b_cla)
    assert jnp.allclose(pooled, r_pooled, atol=2e-3, rtol=2e-3)
    assert jnp.allclose(norm_att, r_norm, atol=2e-3, rtol=2e-3)
    assert jnp.allclose(cla, r_cla, atol=1e-4, rtol=1e-4)

    print("KERNEL_OK")
</pallas_src>

<mosaic_0001>
module attributes {stable_mosaic.version = 11 : i64} {
  func.func @att_block_kernel(%arg0: i32, %arg1: memref<2x32x16xf32, #tpu.memory_space<vmem>>, %arg2: memref<16x32xf32, #tpu.memory_space<vmem>>, %arg3: memref<16x1xf32, #tpu.memory_space<vmem>>, %arg4: memref<2x8xf32, #tpu.memory_space<vmem>>, %arg5: memref<2x8x16xf32, #tpu.memory_space<vmem>>, %arg6: memref<2x8x16xf32, #tpu.memory_space<vmem>>) attributes {dimension_semantics = [#tpu.dimension_semantics<parallel>], iteration_bounds = array<i64: 1>, scalar_prefetch = 0 : i64, scratch_operands = 0 : i64, tpu.core_type = #tpu.core_type<tc>, window_params = [{transform_indices = @transform_0, window_bounds = array<i64: 2, 32, 16>}, {pipeline_mode = #tpu.pipeline_mode<synchronous>, transform_indices = @transform_1, window_bounds = array<i64: 16, 32>}, {pipeline_mode = #tpu.pipeline_mode<synchronous>, transform_indices = @transform_2, window_bounds = array<i64: 16, 1>}, {transform_indices = @transform_3, window_bounds = array<i64: 2, 8>}, {transform_indices = @transform_4, window_bounds = array<i64: 2, 8, 16>}, {transform_indices = @transform_5, window_bounds = array<i64: 2, 8, 16>}]} {
    %c0 = arith.constant 0 : index
    %c0_0 = arith.constant 0 : index
    %0 = vector.load %arg2[%c0, %c0_0] : memref<16x32xf32, #tpu.memory_space<vmem>>, vector<16x32xf32>
    %c0_1 = arith.constant 0 : index
    %c0_2 = arith.constant 0 : index
    %1 = vector.load %arg3[%c0_1, %c0_2] : memref<16x1xf32, #tpu.memory_space<vmem>>, vector<16x1xf32>
    %c0_3 = arith.constant 0 : index
    %c0_4 = arith.constant 0 : index
    %c0_5 = arith.constant 0 : index
    %2 = vector.load %arg1[%c0_3, %c0_4, %c0_5] : memref<2x32x16xf32, #tpu.memory_space<vmem>>, vector<1x32x16xf32>
    %3 = vector.shape_cast %2 : vector<1x32x16xf32> to vector<32x16xf32>
    %cst = arith.constant dense<0.000000e+00> : vector<16x16xf32>
    %4 = tpu.matmul %0, %3, %cst {dimension_numbers = #tpu.dot_dimension_numbers<[1], [0], [0], [1], [0, 0, 1, 1], [], []>} : vector<16x32xf32>, vector<32x16xf32>, vector<16x16xf32> -> vector<16x16xf32>
    %5 = vector.broadcast %1 : vector<16x1xf32> to vector<16x16xf32>
    %6 = arith.addf %4, %5 : vector<16x16xf32>
    %7 = vector.extract_strided_slice %6 {offsets = [0, 0], sizes = [8, 16], strides = [1, 1]} : vector<16x16xf32> to vector<8x16xf32>
    %8 = vector.extract_strided_slice %6 {offsets = [8, 0], sizes = [8, 16], strides = [1, 1]} : vector<16x16xf32> to vector<8x16xf32>
    %9 = math.tanh %7 : vector<8x16xf32>
    %10 = math.exp %9 : vector<8x16xf32>
    %cst_6 = arith.constant dense<0.000000e+00> : vector<8xf32>
    %11 = vector.multi_reduction <add>, %10, %cst_6 [1] : vector<8x16xf32> to vector<8xf32>
    %12 = vector.shape_cast %11 : vector<8xf32> to vector<8x1xf32>
    %13 = tpu.reciprocal %12 {approx = true} : vector<8x1xf32> -> vector<8x1xf32>
    %14 = vector.broadcast %13 : vector<8x1xf32> to vector<8x16xf32>
    %15 = arith.mulf %10, %14 : vector<8x16xf32>
    %16 = arith.mulf %15, %8 : vector<8x16xf32>
    %cst_7 = arith.constant dense<0.000000e+00> : vector<8xf32>
    %17 = vector.multi_reduction <add>, %16, %cst_7 [1] : vector<8x16xf32> to vector<8xf32>
    %c0_8 = arith.constant 0 : index
    %c0_9 = arith.constant 0 : index
    %18 = vector.load %arg4[%c0_8, %c0_9] : memref<2x8xf32, #tpu.memory_space<vmem>>, vector<1x8xf32>
    %19 = vector.shape_cast %18 : vector<1x8xf32> to vector<8xf32>
    %20 = vector.shape_cast %17 : vector<8xf32> to vector<1x8xf32>
    tpu.vector_store %arg4[%c0_8, %c0_9], %20 {strides = array<i32>} : memref<2x8xf32, #tpu.memory_space<vmem>>, vector<1x8xf32>,
    %c0_10 = arith.constant 0 : index
    %c0_11 = arith.constant 0 : index
    %c0_12 = arith.constant 0 : index
    %21 = vector.load %arg5[%c0_10, %c0_11, %c0_12] : memref<2x8x16xf32, #tpu.memory_space<vmem>>, vector<1x8x16xf32>
    %22 = vector.shape_cast %21 : vector<1x8x16xf32> to vector<8x16xf32>
    %23 = vector.shape_cast %15 : vector<8x16xf32> to vector<1x8x16xf32>
    tpu.vector_store %arg5[%c0_10, %c0_11, %c0_12], %23 {strides = array<i32>} : memref<2x8x16xf32, #tpu.memory_space<vmem>>, vector<1x8x16xf32>,
    %c0_13 = arith.constant 0 : index
    %c0_14 = arith.constant 0 : index
    %c0_15 = arith.constant 0 : index
    %24 = vector.load %arg6[%c0_13, %c0_14, %c0_15] : memref<2x8x16xf32, #tpu.memory_space<vmem>>, vector<1x8x16xf32>
    %25 = vector.shape_cast %24 : vector<1x8x16xf32> to vector<8x16xf32>
    %26 = vector.shape_cast %8 : vector<8x16xf32> to vector<1x8x16xf32>
    tpu.vector_store %arg6[%c0_13, %c0_14, %c0_15], %26 {strides = array<i32>} : memref<2x8x16xf32, #tpu.memory_space<vmem>>, vector<1x8x16xf32>,
    %c1 = arith.constant 1 : index
    %c0_16 = arith.constant 0 : index
    %c0_17 = arith.constant 0 : index
    %27 = vector.load %arg1[%c1, %c0_16, %c0_17] : memref<2x32x16xf32, #tpu.memory_space<vmem>>, vector<1x32x16xf32>
    %28 = vector.shape_cast %27 : vector<1x32x16xf32> to vector<32x16xf32>
    %cst_18 = arith.constant dense<0.000000e+00> : vector<16x16xf32>
    %29 = tpu.matmul %0, %28, %cst_18 {dimension_numbers = #tpu.dot_dimension_numbers<[1], [0], [0], [1], [0, 0, 1, 1], [], []>} : vector<16x32xf32>, vector<32x16xf32>, vector<16x16xf32> -> vector<16x16xf32>
    %30 = vector.broadcast %1 : vector<16x1xf32> to vector<16x16xf32>
    %31 = arith.addf %29, %30 : vector<16x16xf32>
    %32 = vector.extract_strided_slice %31 {offsets = [0, 0], sizes = [8, 16], strides = [1, 1]} : vector<16x16xf32> to vector<8x16xf32>
    %33 = vector.extract_strided_slice %31 {offsets = [8, 0], sizes = [8, 16], strides = [1, 1]} : vector<16x16xf32> to vector<8x16xf32>
    %34 = math.tanh %32 : vector<8x16xf32>
    %35 = math.exp %34 : vector<8x16xf32>
    %cst_19 = arith.constant dense<0.000000e+00> : vector<8xf32>
    %36 = vector.multi_reduction <add>, %35, %cst_19 [1] : vector<8x16xf32> to vector<8xf32>
    %37 = vector.shape_cast %36 : vector<8xf32> to vector<8x1xf32>
    %38 = tpu.reciprocal %37 {approx = true} : vector<8x1xf32> -> vector<8x1xf32>
    %39 = vector.broadcast %38 : vector<8x1xf32> to vector<8x16xf32>
    %40 = arith.mulf %35, %39 : vector<8x16xf32>
    %41 = arith.mulf %40, %33 : vector<8x16xf32>
    %cst_20 = arith.constant dense<0.000000e+00> : vector<8xf32>
    %42 = vector.multi_reduction <add>, %41, %cst_20 [1] : vector<8x16xf32> to vector<8xf32>
    %c1_21 = arith.constant 1 : index
    %c0_22 = arith.constant 0 : index
    %43 = vector.load %arg4[%c1_21, %c0_22] : memref<2x8xf32, #tpu.memory_space<vmem>>, vector<1x8xf32>
    %44 = vector.shape_cast %43 : vector<1x8xf32> to vector<8xf32>
    %45 = vector.shape_cast %42 : vector<8xf32> to vector<1x8xf32>
    tpu.vector_store %arg4[%c1_21, %c0_22], %45 {strides = array<i32>} : memref<2x8xf32, #tpu.memory_space<vmem>>, vector<1x8xf32>,
    %c1_23 = arith.constant 1 : index
    %c0_24 = arith.constant 0 : index
    %c0_25 = arith.constant 0 : index
    %46 = vector.load %arg5[%c1_23, %c0_24, %c0_25] : memref<2x8x16xf32, #tpu.memory_space<vmem>>, vector<1x8x16xf32>
    %47 = vector.shape_cast %46 : vector<1x8x16xf32> to vector<8x16xf32>
    %48 = vector.shape_cast %40 : vector<8x16xf32> to vector<1x8x16xf32>
    tpu.vector_store %arg5[%c1_23, %c0_24, %c0_25], %48 {strides = array<i32>} : memref<2x8x16xf32, #tpu.memory_space<vmem>>, vector<1x8x16xf32>,
    %c1_26 = arith.constant 1 : index
    %c0_27 = arith.constant 0 : index
    %c0_28 = arith.constant 0 : index
    %49 = vector.load %arg6[%c1_26, %c0_27, %c0_28] : memref<2x8x16xf32, #tpu.memory_space<vmem>>, vector<1x8x16xf32>
    %50 = vector.shape_cast %49 : vector<1x8x16xf32> to vector<8x16xf32>
    %51 = vector.shape_cast %33 : vector<8x16xf32> to vector<1x8x16xf32>
    tpu.vector_store %arg6[%c1_26, %c0_27, %c0_28], %51 {strides = array<i32>} : memref<2x8x16xf32, #tpu.memory_space<vmem>>, vector<1x8x16xf32>,
    return
  }
  func.func @transform_0(%arg0: i32) -> (i32, i32, i32) {
    %c0_i32 = arith.constant 0 : i32
    %c0_i32_0 = arith.constant 0 : i32
    %c0_i32_1 = arith.constant 0 : i32
    return %arg0, %c0_i32, %c0_i32_0 : i32, i32, i32
  }
  func.func @transform_1(%arg0: i32) -> (i32, i32) {
    %c0_i32 = arith.constant 0 : i32
    %c0_i32_0 = arith.constant 0 : i32
    %c0_i32_1 = arith.constant 0 : i32
    return %c0_i32, %c0_i32_0 : i32, i32
  }
  func.func @transform_2(%arg0: i32) -> (i32, i32) {
    %c0_i32 = arith.constant 0 : i32
    %c0_i32_0 = arith.constant 0 : i32
    %c0_i32_1 = arith.constant 0 : i32
    return %c0_i32, %c0_i32_0 : i32, i32
  }
  func.func @transform_3(%arg0: i32) -> (i32, i32) {
    %c0_i32 = arith.constant 0 : i32
    %c0_i32_0 = arith.constant 0 : i32
    return %arg0, %c0_i32 : i32, i32
  }
  func.func @transform_4(%arg0: i32) -> (i32, i32, i32) {
    %c0_i32 = arith.constant 0 : i32
    %c0_i32_0 = arith.constant 0 : i32
    %c0_i32_1 = arith.constant 0 : i32
    return %arg0, %c0_i32, %c0_i32_0 : i32, i32, i32
  }
  func.func @transform_5(%arg0: i32) -> (i32, i32, i32) {
    %c0_i32 = arith.constant 0 : i32
    %c0_i32_0 = arith.constant 0 : i32
    %c0_i32_1 = arith.constant 0 : i32
    return %arg0, %c0_i32, %c0_i32_0 : i32, i32, i32
  }
}

</mosaic_0001>

<bundles_post_ra>
// kernel: tpu_custom_call.1
= control target key start
LH: loop header
LB: loop body
LE: loop exit
PB: predicated region body
PF: predicated region fallthrough
CT: control target
= control target key end

     0   :  { %11 = vsyncpa [#allocation3], 0  ;;  %s507_s0 = inlined_call_operand.vmem [shape: f32[2,32,16], index: 0, kind: input, shape index: {}]   ;;  %s508_s1 = inlined_call_operand.vmem [shape: f32[16,32], index: 1, kind: input, shape index: {}]   ;;  %s509_s2 = inlined_call_operand.vmem [shape: f32[16,1], index: 2, kind: input, shape index: {}]   ;;  %s510_s3 = inlined_call_operand.hbm [shape: f32[2,8], index: 3, kind: output, shape index: {0}]   ;;  %s511_s4 = inlined_call_operand.hbm [shape: f32[2,8,16], index: 4, kind: output, shape index: {1}]   ;;  %s512_s5 = inlined_call_operand.hbm [shape: f32[2,8,16], index: 5, kind: output, shape index: {2}]  }
   0x1   :  { %v26_v0 = vld [vmem:[%s507_s0 + $0x18] sm:$0xff]  ;;  %v25_v2 = vld [vmem:[%s507_s0 + $0x10] sm:$0xff]  ;;  %v24_v4 = vld [vmem:[%s507_s0 + $0x8] sm:$0xff] }
   0x2   :  { %v297_v1 = vld [vmem:[%s507_s0 + $0x38] sm:$0xff]  ;;  %312 = vmatprep.subr.mxu0 %v26_v0  ;;  %v296_v3 = vld [vmem:[%s507_s0 + $0x30] sm:$0xff]  ;;  %v295_v5 = vld [vmem:[%s507_s0 + $0x28] sm:$0xff] }
   0x3   :  { %323 = vmatprep.subr.mxu1 %v297_v1  ;;  %313 = vmatpush3.msra.mxu0 %v26_v0 }
   0x4   :  { %324 = vmatpush3.msra.mxu1 %v297_v1  ;;  %314 = vmatprep.subr.mxu0 %v25_v2 }
   0x5   :  { %325 = vmatprep.subr.mxu1 %v296_v3 }
   0x6   :  { %12 = vsyncpa [#allocation5], 0  ;;  %315 = vmatpush3.msra.mxu0 %v25_v2  ;;  %326 = vmatpush3.msra.mxu1 %v296_v3  ;;  %v23_v6 = vld [vmem:[%s507_s0] sm:$0xff]  ;;  %vm37_vm0 = vcmask 261120   ;;  %v20_v9 = vld [vmem:[%s508_s1 + $0x8] sm:$0xff]  ;;  %v418_v11 = vmov 0  }
   0x7   :  { %v294_v7 = vld [vmem:[%s507_s0 + $0x20] sm:$0xff]  ;;  %316 = vmatprep.subr.mxu0 %v24_v4  ;;  %327 = vmatprep.subr.mxu1 %v295_v5  ;;  %vm122_vm1 = vcmask 130048   ;;  %v22_v27 = vld [vmem:[%s509_s2 + $0x8] sm:$0xff] }
   0x8   :  { %v19_v8 = vld [vmem:[%s508_s1] sm:$0xff]  ;;  %317 = vmatpush3.msra.mxu0 %v24_v4  ;;  %328 = vmatpush3.msra.mxu1 %v295_v5 }
   0x9   :  { %318 = vmatprep.subr.mxu0 %v23_v6  ;;  %329 = vmatprep.subr.mxu1 %v294_v7  ;;  %v21_v10 = vld [vmem:[%s509_s2] sm:$0xff]  ;;  %s419_s2 = smov [#allocation4]  }
   0xa   :  { %319 = vmatpush3.msra.mxu0 %v23_v6  ;;  %320 = vmatprep.mubr.msk.f32.mxu0 %vm37_vm0, %v19_v8  ;;  %s262_s15 = sshll.u32 %s419_s2, 4  ;;  %s263_s15 = int_to_ptr.vmem [resolvable:$true] %s262_s15 }
   0xb   :  { %330 = vmatpush3.msra.mxu1 %v294_v7  ;;  %331 = vmatprep.mubr.msk.f32.mxu1 %vm37_vm0, %v19_v8  ;;  %s354_s16 = scalar_lea.vmem %s263_s15, 256  ;;  %p359_p1 = scmp.lt.s32.totalorder %s263_s15, %s263_s15 }
   0xc   :  { %321 = vmatmul.mubr.msk.f32.vlgmr.msra.gmra.mxu0 %vm37_vm0, %v20_v9  ;;  %332 = vmatmul.mubr.msk.f32.vlgmr.msra.gmra.mxu1 %vm37_vm0, %v20_v9  ;;  %p355_p0 = scmp.ne.s32.totalorder %s263_s15, %s354_s16  ;;  %p360_p2 = scmp.lt.s32.totalorder %s354_s16, %s354_s16 }
   0xd   :  { %340 = vset.pattern.permute.xlu0 %v418_v11  ;;  %341 = vset.pattern.permute.xlu1 %v418_v11 }
   0xe   :  { %29 = vperm.xlu0 %340, %v21_v10   ;;  %p361_p3 = por %p360_p2, %p359_p1 }
  0x10   :  { %p362_p4 = pnand %p361_p3, %p355_p0 }
  0x89   :  { %v30_v12 = vpop.permute.xlu0 %29 }
  0xcc   :  { %v322_v13 = vpop.f32.mrf.mxu0  ;;  %v333_v14 = vpop.f32.mrf.mxu1 }
  0xce   :  { %v110_v15 = vpop.f32.mrf.mxu0  ;;  %v215_v16 = vpop.f32.mrf.mxu1 }
  0xcf   :  { %v111_v17 = vadd.f32 %v110_v15, %v30_v12  ;;  %v216_v18 = vadd.f32 %v215_v16, %v30_v12 }
  0xd1   :  { %342 = vtanh.f32 %v111_v17 }
  0xd2   :  { %344 = vtanh.f32 %v216_v18 }
  0xde   :  { %v343_v19 = vpop.eup %342 }
  0xdf   :  { %v345_v20 = vpop.eup %344  ;;  %v120_v21 = vmul.f32 1.442695, %v343_v19 }
  0xe0   :  { %v225_v22 = vmul.f32 1.442695, %v345_v20 }
  0xe1   :  { %346 = vpow2.f32 %v120_v21 }
  0xe2   :  { %348 = vpow2.f32 %v225_v22 }
  0xee   :  { %v347_v23 = vpop.eup %346 }
  0xef   :  { %v349_v24 = vpop.eup %348  ;;  %v123_v25 = vsel %vm122_vm1, %v347_v23, 0.0 }
  0xf0   :  { %v227_v26 = vsel %vm122_vm1, %v349_v24, 0.0  ;;  %124 = vadd.xlane.f32.xlu0 %v123_v25 }
  0xf1   :  { %228 = vadd.xlane.f32.xlu1 %v227_v26 }
 0x102   :  { %34 = vperm.xlu1 %341, %v22_v27  }
 0x179   :  { %v125_v28 = vpop.xlane.xlu0 %124 }
 0x17a   :  { %v229_v29 = vpop.xlane.xlu1 %228  ;;  %350 = vrcp.f32 %v125_v28 }
 0x17b   :  { %352 = vrcp.f32 %v229_v29 }
 0x17e   :  { %v35_v30 = vpop.permute.xlu1 %34 }
 0x17f   :  { %v116_v31 = vadd.f32 %v322_v13, %v35_v30  ;;  %v221_v32 = vadd.f32 %v333_v14, %v35_v30 }
 0x181   :  { %143 = vst.msk [vmem:[#allocation6] sm:$0xff] %vm122_vm1, %v116_v31  ;;  %246 = vst.msk [vmem:[#allocation6 + $0x8] sm:$0xff] %vm122_vm1, %v221_v32 }
 0x187   :  { %v351_v33 = vpop.eup %350 }
 0x188   :  { %v353_v34 = vpop.eup %352  ;;  %v127_v35 = vmul.f32 %v351_v33, %v347_v23 }
 0x189   :  { %v231_v36 = vmul.f32 %v353_v34, %v349_v24 }
 0x18a   :  { %v128_v37 = vmul.f32 %v127_v35, %v116_v31  ;;  %142 = vst.msk [vmem:[#allocation4] sm:$0xff] %vm122_vm1, %v127_v35 }
 0x18b   :  { %v232_v38 = vmul.f32 %v231_v36, %v221_v32  ;;  %244 = vst.msk [vmem:[#allocation4 + $0x8] sm:$0xff] %vm122_vm1, %v231_v36 }
 0x18c   :  { %v129_v39 = vsel %vm122_vm1, %v128_v37, 0.0 }
 0x18d   :  { %v233_v40 = vsel %vm122_vm1, %v232_v38, 0.0  ;;  %130 = vadd.xlane.f32.xlu1 %v129_v39 }
 0x18e   :  { %234 = vadd.xlane.f32.xlu0 %v233_v40 }
 0x18f   :  { %365 = shalt.err (!%p362_p4)
}
 0x190   :  { %s420_s17 = smov 128   ;;  %s421_s18 = smov 8  }
 0x191   :  { %268 = dma.vmem_to_hbm [thread:$0]  %s263_s15, 256, %s511_s4, [#allocation5], %s420_s17, %s420_s17, %s421_s18  }
 0x192   :  { %s422_s21 = smov [#allocation6]  }
 0x193   :  { %s274_s22 = sshll.u32 %s422_s21, 4  ;;  %s275_s22 = int_to_ptr.vmem [resolvable:$true] %s274_s22 }
 0x194   :  { %s374_s23 = scalar_lea.vmem %s275_s22, 256  ;;  %p379_p6 = scmp.lt.s32.totalorder %s275_s22, %s275_s22 }
 0x195   :  { %p375_p5 = scmp.ne.s32.totalorder %s275_s22, %s374_s23  ;;  %p380_p7 = scmp.lt.s32.totalorder %s374_s23, %s374_s23 }
 0x197   :  { %p381_p8 = por %p380_p7, %p379_p6 }
 0x199   :  { %p382_p9 = pnand %p381_p8, %p375_p5 }
 0x19b   :  { %385 = shalt.err (!%p382_p9)
}
 0x19c   :  { %280 = dma.vmem_to_hbm [thread:$0]  %s275_s22, 256, %s512_s5, [#allocation5], %s420_s17, %s420_s17, %s421_s18   ;;  %v133_v41 = vlaneseq  ;;  %vm140_vm2 = vcmask 57344  }
 0x19d   :  { %s423_s26 = smov [#allocation2]  }
 0x19e   :  { %v134_v42 = vand.u32 127, %v133_v41  ;;  %v136_v43 = vshrl.u32 %v133_v41, 7  ;;  %s253_s4 = sshll.u32 %s423_s26, 4  ;;  %s254_s4 = int_to_ptr.vmem [resolvable:$true] %s253_s4 }
 0x19f   :  { %s394_s27 = scalar_lea.vmem %s254_s4, 32  ;;  %p399_p11 = scmp.lt.s32.totalorder %s254_s4, %s254_s4 }
 0x1a0   :  { %v137_v44 = vsub.s32 %v134_v42, %v136_v43  ;;  %p395_p10 = scmp.ne.s32.totalorder %s254_s4, %s394_s27  ;;  %p400_p12 = scmp.lt.s32.totalorder %s394_s27, %s394_s27 }
 0x1a2   :  { %p401_p13 = por %p400_p12, %p399_p11 }
 0x1a4   :  { %p402_p0 = pnand %p401_p13, %p395_p10 }
 0x216   :  { %v131_v45 = vpop.xlane.xlu1 %130 }
 0x217   :  { %v138_v46 = vrot.slane %v131_v45, %v137_v44  ;;  %v235_v47 = vpop.xlane.xlu0 %234 }
 0x218   :  { %v240_v48 = vrot.slane %v235_v47, %v137_v44 }
 0x219   :  { %141 = vst.msk [vmem:[#allocation2] sm:$0x1] %vm140_vm2, %v138_v46 }
 0x21a   :  { %242 = vst.msk [vmem:[#allocation2 + $0x1] sm:$0x1] %vm140_vm2, %v240_v48 }
 0x21b   :  { %405 = shalt.err (!%p402_p0)
}
 0x21c   :  { %256 = dma.vmem_to_hbm [thread:$0]  %s254_s4, 32, %s510_s3, [#allocation3]  }
 0x21d   :  { %414 = dma.done.wait [#allocation3], 32  }
 0x21e   :  { %415 = vsyncadd [#allocation3], 4294967264 }
 0x21f   :  { %416 = dma.done.wait [#allocation5], 512  }
 0x220   :  { %417 = vsyncadd [#allocation5], 4294966784 }
 0x221   :  { %290 = vsyncpa [#allocation3], 1 }
 0x222   :  { %291 = vsyncpa [#allocation5], 1 }

</bundles_post_ra>
